<compile_context>
chip_gen: v6e
topology: v6e:2x2x1
jax: 0.10.0
libtpu: 0.0.40
codegen_flags: <defaults>
</compile_context>

<pallas_src>
import jax
import jax.numpy as jnp
from jax.experimental import pallas as pl
from jax.experimental.pallas import tpu as pltpu

_LANE = 128
_SUBLANE = 8


def _round_up(x, m):
    return (x + m - 1) // m * m


def _make_kernel(negative_slope, split_heads, highest_precision):
    prec = jax.lax.Precision.HIGHEST if highest_precision else None

    def kernel(x_ref, w1_ref, b1_ref, wh_ref, bh_ref, *out_and_scratch):
        if split_heads:
            mean_ref, var_ref, acc_ref = out_and_scratch
        else:
            out_ref, acc_ref = out_and_scratch

        k = pl.program_id(1)

        @pl.when(k == 0)
        def _init():
            acc_ref[...] = jnp.zeros_like(acc_ref)

        # Cast x to the MXU operand dtype in-kernel (no wrapper-side cast traffic).
        x = x_ref[...].astype(w1_ref.dtype)
        acc_ref[...] += jnp.dot(x, w1_ref[...],
                                preferred_element_type=jnp.float32,
                                precision=prec)

        @pl.when(k == pl.num_programs(1) - 1)
        def _finalize():
            # TODO(synk): for H >> 512, chunk the hidden dimension here instead of
            # materializing the full (blk, H) f32 intermediate between the two dots.
            h = acc_ref[...] + b1_ref[...]                      # f32 bias add (VPU)
            h = jnp.where(h > 0, h, negative_slope * h)         # LeakyReLU(0.2), f32
            y = jnp.dot(h.astype(wh_ref.dtype), wh_ref[...],
                        preferred_element_type=jnp.float32,
                        precision=prec) + bh_ref[...]
            if split_heads:
                L = mean_ref.shape[-1]                          # lane-aligned split
                mean_ref[...] = y[:, :L].astype(mean_ref.dtype)
                var_ref[...] = y[:, L:2 * L].astype(var_ref.dtype)
            else:
                out_ref[...] = y.astype(out_ref.dtype)

    return kernel


def prepare_encoder_params(params, *, use_bf16=True):
    """One-time weight prep: fuse the two heads, pad to a 128-multiple (if needed),
    cast MXU operands. Amortizes to zero across forward calls."""
    w1, b1 = params["w1"], params["b1"]
    wm, bm, wv, bv = params["wm"], params["bm"], params["wv"], params["bv"]
    H, L = wm.shape

    wh = jnp.concatenate([wm, wv], axis=1)        # [H, 2L]
    bh = jnp.concatenate([bm, bv], axis=1)        # [1, 2L]

    split_heads = (L % _LANE == 0)                # two lane-dense outputs possible
    if not split_heads:
        n_pad = _round_up(max(2 * L, _LANE), _LANE)
        if n_pad != 2 * L:
            wh = jnp.pad(wh, ((0, 0), (0, n_pad - 2 * L)))
            bh = jnp.pad(bh, ((0, 0), (0, n_pad - 2 * L)))

    mxu_dtype = jnp.bfloat16 if use_bf16 else jnp.float32
    return {
        "w1": w1.astype(mxu_dtype),
        "b1": b1.astype(jnp.float32),
        "wh": wh.astype(mxu_dtype),
        "bh": bh.astype(jnp.float32),
        "latent_dim": L,
        "split_heads": split_heads,
    }


def encoder_forward(x, prep, *, block_b=256, block_k=512):
    """x: [B, input_dim] float32. prep: output of prepare_encoder_params.
    Returns (mean, log_var), each [B, latent_dim] float32."""
    w1, b1, wh, bh = prep["w1"], prep["b1"], prep["wh"], prep["bh"]
    L = prep["latent_dim"]
    split_heads = prep["split_heads"]
    n_out = 2 * L

    B, D_in = x.shape
    H = w1.shape[1]
    n_cols = wh.shape[1]                      # 2L (split) or padded slab width
    wsize = w1.dtype.itemsize

    # --- batch tiling: big M-tiles, but >= 2 grid steps for v7x megacore ---
    blk = min(block_b, _round_up(B, _SUBLANE))
    if B > _SUBLANE:
        blk = min(blk, _round_up(pl.cdiv(B, 2), _SUBLANE))
    blk = max(_SUBLANE, _round_up(blk, _SUBLANE))
    B_pad = _round_up(B, blk)
    x_in = x if B_pad == B else jnp.pad(x, ((0, B_pad - B), (0, 0)))

    # --- K-tiling of the first matmul (reduction axis last in the grid) ---
    if D_in % _LANE == 0 and D_in > block_k:
        tk = _round_up(block_k, _LANE)
        while D_in % tk != 0:
            tk -= _LANE
    else:
        tk = D_in                             # full extent: (8,128) rule satisfied
    grid = (B_pad // blk, D_in // tk)

    # --- VMEM budget from the actual tile footprint, capped per generation ---
    footprint = (2 * blk * tk * x.dtype.itemsize     # x tile (double-buffered)
                 + 2 * tk * H * wsize                # W1 K-tile (double-buffered)
                 + H * 4 + n_cols * 4                # b1 / bh (single-buffered)
                 + H * n_cols * wsize                # fused head weight (single-buffered)
                 + 2 * blk * n_cols * 4              # output tile
                 + blk * H * 4)                      # f32 accumulator scratch
    try:
        vmem_cap = pltpu.get_tpu_info().vmem_capacity_bytes
    except Exception:
        vmem_cap = 64 * 1024 * 1024          # conservative (v7x per-TC) fallback
    vmem_limit = int(min(max(2 * footprint + (2 << 20), 32 << 20),
                         0.75 * vmem_cap))

    # Grid-invariant weights/biases: constant index_map + single buffer.
    def invariant(shape):
        return pl.BlockSpec(shape, lambda i, k: (0, 0),
                            pipeline_mode=pl.Buffered(1))

    in_specs = [
        pl.BlockSpec((blk, tk), lambda i, k: (i, k)),   # x tile
        pl.BlockSpec((tk, H), lambda i, k: (k, 0)),     # W1 K-tile
        invariant((1, H)),                              # b1
        invariant((H, n_cols)),                         # fused head weight
        invariant((1, n_cols)),                         # fused head bias
    ]
    if split_heads:
        out_shape = (jax.ShapeDtypeStruct((B_pad, L), jnp.float32),
                     jax.ShapeDtypeStruct((B_pad, L), jnp.float32))
        out_specs = (pl.BlockSpec((blk, L), lambda i, k: (i, 0)),
                     pl.BlockSpec((blk, L), lambda i, k: (i, 0)))
    else:
        out_shape = jax.ShapeDtypeStruct((B_pad, n_cols), jnp.float32)
        out_specs = pl.BlockSpec((blk, n_cols), lambda i, k: (i, 0))

    flops = 2 * B_pad * D_in * H + 2 * B_pad * H * n_cols
    bytes_accessed = (B_pad * D_in * x.dtype.itemsize
                      + D_in * H * wsize + H * 4
                      + H * n_cols * wsize + n_cols * 4
                      + B_pad * (2 * L if split_heads else n_cols) * 4)

    kernel = _make_kernel(negative_slope=0.2, split_heads=split_heads,
                          highest_precision=(w1.dtype == jnp.float32))

    out = pl.pallas_call(
        kernel,
        out_shape=out_shape,
        grid_spec=pltpu.PrefetchScalarGridSpec(
            num_scalar_prefetch=0,
            grid=grid,
            in_specs=in_specs,
            out_specs=out_specs,
            scratch_shapes=[pltpu.VMEM((blk, H), jnp.float32)],
        ),
        compiler_params=pltpu.CompilerParams(
            dimension_semantics=("parallel", "arbitrary"),
            vmem_limit_bytes=vmem_limit,
        ),
        cost_estimate=pl.CostEstimate(
            flops=flops, transcendentals=0, bytes_accessed=bytes_accessed),
    )(x_in, w1, b1, wh, bh)

    if split_heads:
        mean, log_var = out
        return mean[:B], log_var[:B]
    return out[:B, :L], out[:B, L:n_out]


def init_encoder_params(key, input_dim, hidden_dim, latent_dim):
    """Deterministic synthetic init (uniform, PyTorch-Linear-like scale)."""
    ks = jax.random.split(key, 6)

    def lin(kw, kb, fan_in, fan_out):
        bound = 1.0 / jnp.sqrt(fan_in)
        # stored as [in, out] (transposed vs. torch's [out, in])
        w = jax.random.uniform(kw, (fan_in, fan_out), jnp.float32, -bound, bound)
        b = jax.random.uniform(kb, (1, fan_out), jnp.float32, -bound, bound)
        return w, b

    w1, b1 = lin(ks[0], ks[1], input_dim, hidden_dim)
    wm, bm = lin(ks[2], ks[3], hidden_dim, latent_dim)
    wv, bv = lin(ks[4], ks[5], hidden_dim, latent_dim)
    return {"w1": w1, "b1": b1, "wm": wm, "bm": bm, "wv": wv, "bv": bv}


def _reference(x, p):
    h = x @ p["w1"] + p["b1"]
    h = jnp.where(h > 0, h, 0.2 * h)
    return h @ p["wm"] + p["bm"], h @ p["wv"] + p["bv"]


if __name__ == "__main__":
    key = jax.random.PRNGKey(0)
    k_x, k_p = jax.random.split(key)

    B, input_dim, hidden_dim, latent_dim = 8, 32, 32, 16
    x = jax.random.normal(k_x, (B, input_dim), jnp.float32)
    params = init_encoder_params(k_p, input_dim, hidden_dim, latent_dim)
    ref_mean, ref_logvar = _reference(x, params)

    # f32 MXU operands (precision=HIGHEST inside the kernel) -> tight tolerance.
    prep_f32 = prepare_encoder_params(params, use_bf16=False)
    mean, log_var = encoder_forward(x, prep_f32)
    mean, log_var = jax.block_until_ready((mean, log_var))
    assert mean.shape == (B, latent_dim) and log_var.shape == (B, latent_dim)
    assert jnp.allclose(mean, ref_mean, atol=1e-5, rtol=1e-5)
    assert jnp.allclose(log_var, ref_logvar, atol=1e-5, rtol=1e-5)

    # bf16 MXU operands, f32 accumulation (default fast path) -> looser tolerance.
    prep_bf16 = prepare_encoder_params(params)          # use_bf16=True by default
    mean_bf, logvar_bf = encoder_forward(x, prep_bf16)
    mean_bf, logvar_bf = jax.block_until_ready((mean_bf, logvar_bf))
    assert jnp.allclose(mean_bf, ref_mean, atol=5e-2, rtol=5e-2)
    assert jnp.allclose(logvar_bf, ref_logvar, atol=5e-2, rtol=5e-2)

    print("KERNEL_OK")
</pallas_src>

<mosaic_0001>
module attributes {stable_mosaic.version = 11 : i64} {
  func.func @kernel(%arg0: i32, %arg1: i32, %arg2: memref<8x32xf32, #tpu.memory_space<vmem>>, %arg3: memref<32x32xf32, #tpu.memory_space<vmem>>, %arg4: memref<1x32xf32, #tpu.memory_space<vmem>>, %arg5: memref<32x128xf32, #tpu.memory_space<vmem>>, %arg6: memref<1x128xf32, #tpu.memory_space<vmem>>, %arg7: memref<8x128xf32, #tpu.memory_space<vmem>>, %arg8: memref<8x32xf32, #tpu.memory_space<vmem>>) attributes {dimension_semantics = [#tpu.dimension_semantics<parallel>, #tpu.dimension_semantics<arbitrary>], iteration_bounds = array<i64: 1, 1>, scalar_prefetch = 0 : i64, scratch_operands = 1 : i64, tpu.core_type = #tpu.core_type<tc>, window_params = [{transform_indices = @transform_0, window_bounds = array<i64: 8, 32>}, {transform_indices = @transform_1, window_bounds = array<i64: 32, 32>}, {pipeline_mode = #tpu.pipeline_mode<synchronous>, transform_indices = @transform_2, window_bounds = array<i64: 1, 32>}, {pipeline_mode = #tpu.pipeline_mode<synchronous>, transform_indices = @transform_3, window_bounds = array<i64: 32, 128>}, {pipeline_mode = #tpu.pipeline_mode<synchronous>, transform_indices = @transform_4, window_bounds = array<i64: 1, 128>}, {transform_indices = @transform_5, window_bounds = array<i64: 8, 128>}]} {
    %c0_i32 = arith.constant 0 : i32
    %0 = arith.cmpi eq, %arg1, %c0_i32 : i32
    %1 = arith.extui %0 : i1 to i32
    %c0_i32_0 = arith.constant 0 : i32
    %2 = arith.cmpi ne, %1, %c0_i32_0 : i32
    scf.if %2 {
      %cst_10 = arith.constant 0.000000e+00 : f32
      %12 = vector.broadcast %cst_10 : f32 to vector<8x32xf32>
      %c0_11 = arith.constant 0 : index
      %c0_12 = arith.constant 0 : index
      %13 = vector.load %arg8[%c0_11, %c0_12] : memref<8x32xf32, #tpu.memory_space<vmem>>, vector<8x32xf32>
      tpu.vector_store %arg8[%c0_11, %c0_12], %12 {strides = array<i32>} : memref<8x32xf32, #tpu.memory_space<vmem>>, vector<8x32xf32>,
    } else {
    }
    %c0 = arith.constant 0 : index
    %c0_1 = arith.constant 0 : index
    %3 = vector.load %arg2[%c0, %c0_1] : memref<8x32xf32, #tpu.memory_space<vmem>>, vector<8x32xf32>
    %c0_2 = arith.constant 0 : index
    %c0_3 = arith.constant 0 : index
    %4 = vector.load %arg8[%c0_2, %c0_3] : memref<8x32xf32, #tpu.memory_space<vmem>>, vector<8x32xf32>
    %c0_4 = arith.constant 0 : index
    %c0_5 = arith.constant 0 : index
    %5 = vector.load %arg3[%c0_4, %c0_5] : memref<32x32xf32, #tpu.memory_space<vmem>>, vector<32x32xf32>
    %cst = arith.constant dense<0.000000e+00> : vector<8x32xf32>
    %6 = tpu.matmul %3, %5, %cst {dimension_numbers = #tpu.dot_dimension_numbers<[1], [0], [0], [1], [0, 0, 1, 1], [], []>, precision = #tpu.contract_precision<fp32>} : vector<8x32xf32>, vector<32x32xf32>, vector<8x32xf32> -> vector<8x32xf32>
    %7 = arith.addf %4, %6 : vector<8x32xf32>
    %c0_6 = arith.constant 0 : index
    %c0_7 = arith.constant 0 : index
    %8 = vector.load %arg8[%c0_6, %c0_7] : memref<8x32xf32, #tpu.memory_space<vmem>>, vector<8x32xf32>
    tpu.vector_store %arg8[%c0_6, %c0_7], %7 {strides = array<i32>} : memref<8x32xf32, #tpu.memory_space<vmem>>, vector<8x32xf32>,
    %c0_i32_8 = arith.constant 0 : i32
    %9 = arith.cmpi eq, %arg1, %c0_i32_8 : i32
    %10 = arith.extui %9 : i1 to i32
    %c0_i32_9 = arith.constant 0 : i32
    %11 = arith.cmpi ne, %10, %c0_i32_9 : i32
    scf.if %11 {
      %c0_10 = arith.constant 0 : index
      %c0_11 = arith.constant 0 : index
      %12 = vector.load %arg8[%c0_10, %c0_11] : memref<8x32xf32, #tpu.memory_space<vmem>>, vector<8x32xf32>
      %c0_12 = arith.constant 0 : index
      %c0_13 = arith.constant 0 : index
      %13 = vector.load %arg4[%c0_12, %c0_13] : memref<1x32xf32, #tpu.memory_space<vmem>>, vector<1x32xf32>
      %14 = vector.broadcast %13 : vector<1x32xf32> to vector<8x32xf32>
      %15 = arith.addf %12, %14 : vector<8x32xf32>
      %cst_14 = arith.constant 0.000000e+00 : f32
      %16 = vector.broadcast %cst_14 : f32 to vector<8x32xf32>
      %17 = arith.cmpf ogt, %15, %16 : vector<8x32xf32>
      %cst_15 = arith.constant 2.000000e-01 : f32
      %18 = vector.broadcast %cst_15 : f32 to vector<8x32xf32>
      %19 = arith.mulf %18, %15 : vector<8x32xf32>
      %20 = arith.select %17, %15, %19 : vector<8x32xi1>, vector<8x32xf32>
      %c0_16 = arith.constant 0 : index
      %c0_17 = arith.constant 0 : index
      %21 = vector.load %arg5[%c0_16, %c0_17] : memref<32x128xf32, #tpu.memory_space<vmem>>, vector<32x128xf32>
      %cst_18 = arith.constant dense<0.000000e+00> : vector<8x128xf32>
      %22 = tpu.matmul %20, %21, %cst_18 {dimension_numbers = #tpu.dot_dimension_numbers<[1], [0], [0], [1], [0, 0, 1, 1], [], []>, precision = #tpu.contract_precision<fp32>} : vector<8x32xf32>, vector<32x128xf32>, vector<8x128xf32> -> vector<8x128xf32>
      %c0_19 = arith.constant 0 : index
      %c0_20 = arith.constant 0 : index
      %23 = vector.load %arg6[%c0_19, %c0_20] : memref<1x128xf32, #tpu.memory_space<vmem>>, vector<1x128xf32>
      %24 = vector.broadcast %23 : vector<1x128xf32> to vector<8x128xf32>
      %25 = arith.addf %22, %24 : vector<8x128xf32>
      %c0_21 = arith.constant 0 : index
      %c0_22 = arith.constant 0 : index
      %26 = vector.load %arg7[%c0_21, %c0_22] : memref<8x128xf32, #tpu.memory_space<vmem>>, vector<8x128xf32>
      tpu.vector_store %arg7[%c0_21, %c0_22], %25 {strides = array<i32>} : memref<8x128xf32, #tpu.memory_space<vmem>>, vector<8x128xf32>,
    } else {
    }
    return
  }
  func.func @transform_0(%arg0: i32, %arg1: i32) -> (i32, i32) {
    %c0_i32 = arith.constant 0 : i32
    return %arg0, %arg1 : i32, i32
  }
  func.func @transform_1(%arg0: i32, %arg1: i32) -> (i32, i32) {
    %c0_i32 = arith.constant 0 : i32
    %c0_i32_0 = arith.constant 0 : i32
    return %arg1, %c0_i32 : i32, i32
  }
  func.func @transform_2(%arg0: i32, %arg1: i32) -> (i32, i32) {
    %c0_i32 = arith.constant 0 : i32
    %c0_i32_0 = arith.constant 0 : i32
    %c0_i32_1 = arith.constant 0 : i32
    return %c0_i32, %c0_i32_0 : i32, i32
  }
  func.func @transform_3(%arg0: i32, %arg1: i32) -> (i32, i32) {
    %c0_i32 = arith.constant 0 : i32
    %c0_i32_0 = arith.constant 0 : i32
    %c0_i32_1 = arith.constant 0 : i32
    return %c0_i32, %c0_i32_0 : i32, i32
  }
  func.func @transform_4(%arg0: i32, %arg1: i32) -> (i32, i32) {
    %c0_i32 = arith.constant 0 : i32
    %c0_i32_0 = arith.constant 0 : i32
    %c0_i32_1 = arith.constant 0 : i32
    return %c0_i32, %c0_i32_0 : i32, i32
  }
  func.func @transform_5(%arg0: i32, %arg1: i32) -> (i32, i32) {
    %c0_i32 = arith.constant 0 : i32
    %c0_i32_0 = arith.constant 0 : i32
    return %arg0, %c0_i32 : i32, i32
  }
}

</mosaic_0001>

<bundles_post_ra>
// kernel: tpu_custom_call.1
= control target key start
LH: loop header
LB: loop body
LE: loop exit
PB: predicated region body
PF: predicated region fallthrough
CT: control target
= control target key end

     0   :  { %10 = vsyncpa [#allocation4], 0  ;;  %s1605_s0 = inlined_call_operand.hbm [shape: f32[8,32], index: 0, kind: input, shape index: {}]   ;;  %s1606_s1 = inlined_call_operand.hbm [shape: f32[32,32], index: 1, kind: input, shape index: {}]   ;;  %s1607_s2 = inlined_call_operand.vmem [shape: f32[1,32], index: 2, kind: input, shape index: {}]   ;;  %s1608_s3 = inlined_call_operand.hbm [shape: f32[32,128], index: 3, kind: input, shape index: {}]   ;;  %s1609_s4 = inlined_call_operand.vmem [shape: f32[1,128], index: 4, kind: input, shape index: {}]   ;;  %s1610_s5 = inlined_call_operand.hbm [shape: f32[8,128], index: 5, kind: output, shape index: {}]  }
   0x1   :  { %11 = vsyncpa [#allocation7], 0 }
   0x2   :  { %12 = vsyncpa [#allocation5], 0  ;;  %s1382_s18 = smov [#allocation6]  }
   0x3   :  { %s28_s19 = sshll.u32 %s1382_s18, 4  ;;  %s29_s19 = int_to_ptr.vmem [resolvable:$true] %s28_s19 }
   0x4   :  { %s1304_s20 = scalar_lea.vmem %s29_s19, 512  ;;  %p1309_p1 = scmp.lt.s32.totalorder %s29_s19, %s29_s19 }
   0x5   :  { %p1305_p0 = scmp.ne.s32.totalorder %s29_s19, %s1304_s20  ;;  %p1310_p2 = scmp.lt.s32.totalorder %s1304_s20, %s1304_s20 }
   0x7   :  { %p1311_p3 = por %p1310_p2, %p1309_p1 }
   0x9   :  { %p1312_p4 = pnand %p1311_p3, %p1305_p0 }
   0xb   :  { %1315 = shalt.err (!%p1312_p4)
}
   0xc   :  { %s1383_s21 = smov 128   ;;  %s1384_s22 = smov 8  }
   0xd   :  { %34 = dma.hbm_to_vmem [thread:$0]  %s1606_s1, 512, %s29_s19, [#allocation7], %s1383_s21, %s1383_s21, %s1384_s22  }
   0xe   :  { %s1385_s25 = smov [#allocation3]   ;;  %s1386_s27 = smov [#allocation8]  }
   0xf   :  { %s19_s26 = sshll.u32 %s1385_s25, 4  ;;  %s42_s28 = sshll.u32 %s1386_s27, 4  ;;  %s20_s26 = int_to_ptr.vmem [resolvable:$true] %s19_s26  ;;  %s43_s28 = int_to_ptr.vmem [resolvable:$true] %s42_s28 }
  0x10   :  { %s1324_s29 = scalar_lea.vmem %s20_s26, 128  ;;  %p1329_p6 = scmp.lt.s32.totalorder %s20_s26, %s20_s26 }
  0x11   :  { %p1325_p5 = scmp.ne.s32.totalorder %s20_s26, %s1324_s29  ;;  %p1330_p7 = scmp.lt.s32.totalorder %s1324_s29, %s1324_s29 }
  0x13   :  { %p1331_p8 = por %p1330_p7, %p1329_p6 }
  0x15   :  { %p1332_p9 = pnand %p1331_p8, %p1325_p5 }
  0x17   :  { %1335 = shalt.err (!%p1332_p9)
}
  0x18   :  { %22 = dma.hbm_to_vmem [thread:$0]  %s1605_s0, 128, %s20_s26, [#allocation4]  }
  0x19   :  { %s1344_s7 = scalar_lea.vmem %s43_s28, 512  ;;  %p1349_p11 = scmp.lt.s32.totalorder %s43_s28, %s43_s28 }
  0x1a   :  { %p1345_p10 = scmp.ne.s32.totalorder %s43_s28, %s1344_s7  ;;  %p1350_p12 = scmp.lt.s32.totalorder %s1344_s7, %s1344_s7 }
  0x1c   :  { %p1351_p13 = por %p1350_p12, %p1349_p11 }
  0x1e   :  { %p1352_p0 = pnand %p1351_p13, %p1345_p10 }
  0x20   :  { %1355 = shalt.err (!%p1352_p0)
}
  0x21   :  { %48 = dma.hbm_to_vmem [thread:$0]  %s1608_s3, 512, %s43_s28, [#allocation7], %s1383_s21, %s1383_s21, %s1384_s22  }
  0x22   :  { %1376 = dma.done.wait [#allocation4], 128  }
  0x23   :  { %1377 = vsyncadd [#allocation4], 4294967168 }
  0x24   :  { %1378 = dma.done.wait [#allocation7], 1024  }
  0x25   :  { %1379 = vsyncadd [#allocation7], 4294966272  ;;  %vm64_vm0 = vcmask 261120   ;;  %v1387_v0 = vmov 0.0   ;;  %vm1388_vm1 = vmmov 0   ;;  %v71_v1 = vld [vmem:[#allocation6 + $0x18] sm:$0xff] }
  0x26   :  { %1156 = vmatprep.subr.mxu0 %v1387_v0  ;;  %1167 = vmatprep.subr.mxu1 %v1387_v0  ;;  %65 = vst.msk [vmem:[#allocation2] sm:$0xff] %vm64_vm0, %v1387_v0  ;;  %v70_v2 = vld [vmem:[#allocation6 + $0x10] sm:$0xff]  ;;  %v69_v3 = vld [vmem:[#allocation6 + $0x8] sm:$0xff]  ;;  %v1437_v4 = vand.u32 4294901760, %v71_v1  ;;  %v68_v7 = vld [vmem:[#allocation6] sm:$0xff]  ;;  %s1389_s10 = smov [#allocation9]  }
  0x27   :  { %1164 = vmatprep.mubr.msk.f32.mxu0 %vm1388_vm1, %v1387_v0  ;;  %1175 = vmatprep.mubr.msk.f32.mxu1 %vm1388_vm1, %v1387_v0  ;;  %v1439_v5 = vand.u32 4294901760, %v70_v2  ;;  %v1441_v6 = vand.u32 4294901760, %v69_v3  ;;  %v66_v8 = vld [vmem:[#allocation3] sm:$0xff]  ;;  %v1443_v9 = vand.u32 4294901760, %v68_v7  ;;  %v580_v34 = vld [vmem:[#allocation8 + $0x10] sm:$0xff]  ;;  %v579_v37 = vld [vmem:[#allocation8 + $0x8] sm:$0xff] }
  0x28   :  { %v74_v10 = vsel %vm64_vm0, %v66_v8, 0  ;;  %1157 = vmatpush3.msra.mxu0 %v1437_v4  ;;  %v181_v11 = vsub.f32 %v71_v1, %v1437_v4  ;;  %v581_v32 = vld [vmem:[#allocation8 + $0x18] sm:$0xff]  ;;  %v1509_v36 = vand.u32 4294901760, %v580_v34  ;;  %v578_v38 = vld [vmem:[#allocation8] sm:$0xff]  ;;  %v1512_v39 = vand.u32 4294901760, %v579_v37  ;;  %s1084_s11 = sshll.u32 %s1389_s10, 4  ;;  %s1085_s11 = int_to_ptr.vmem [resolvable:$true] %s1084_s11 }
  0x29   :  { %v1448_v12 = vand.u32 4294901760, %v74_v10  ;;  %v188_v13 = vsub.f32 %v70_v2, %v1439_v5  ;;  %v195_v14 = vsub.f32 %v69_v3, %v1441_v6  ;;  %1158 = vmatprep.subr.mxu0 %v1387_v0  ;;  %v202_v15 = vsub.f32 %v68_v7, %v1443_v9  ;;  %s1356_s12 = scalar_lea.vmem %s1085_s11, 128  ;;  %p1361_p2 = scmp.lt.s32.totalorder %s1085_s11, %s1085_s11 }
  0x2a   :  { %1159 = vmatpush3.msra.mxu0 %v1439_v5  ;;  %v182_v16 = vand.u32 4294901760, %v181_v11  ;;  %v1504_v33 = vand.u32 4294901760, %v581_v32  ;;  %v1514_v40 = vand.u32 4294901760, %v578_v38  ;;  %v1519_v42 = vsub.f32 %v580_v34, %v1509_v36  ;;  %p1357_p1 = scmp.ne.s32.totalorder %s1085_s11, %s1356_s12  ;;  %p1362_p3 = scmp.lt.s32.totalorder %s1356_s12, %s1356_s12 }
  0x2b   :  { %v146_v17 = vsub.f32 %v74_v10, %v1448_v12  ;;  %v189_v18 = vand.u32 4294901760, %v188_v13  ;;  %v196_v19 = vand.u32 4294901760, %v195_v14  ;;  %1160 = vmatprep.subr.mxu0 %v1387_v0  ;;  %v203_v20 = vand.u32 4294901760, %v202_v15 }
  0x2c   :  { %1161 = vmatpush3.msra.mxu0 %v1441_v6  ;;  %v183_v21 = vsub.f32 %v181_v11, %v182_v16  ;;  %v1507_v35 = vsub.f32 %v581_v32, %v1504_v33  ;;  %v1523_v43 = vsub.f32 %v579_v37, %v1512_v39  ;;  %v1526_v44 = vsub.f32 %v578_v38, %v1514_v40  ;;  %p1363_p4 = por %p1362_p3, %p1361_p2 }
  0x2d   :  { %v147_v22 = vand.u32 4294901760, %v146_v17  ;;  %v190_v23 = vsub.f32 %v188_v13, %v189_v18  ;;  %v197_v24 = vsub.f32 %v195_v14, %v196_v19  ;;  %1162 = vmatprep.subr.mxu0 %v1387_v0  ;;  %v204_v28 = vsub.f32 %v202_v15, %v203_v20  ;;  %v67_v7 = vld [vmem:[#allocation2] sm:$0xff] }
  0x2e   :  { %1163 = vmatpush3.msra.mxu0 %v1443_v9  ;;  %v184_v25 = vand.u32 4294901760, %v183_v21  ;;  %v698_v41 = vand.u32 4294901760, %v1507_v35  ;;  %v705_v46 = vand.u32 4294901760, %v1519_v42  ;;  %v712_v47 = vand.u32 4294901760, %v1523_v43  ;;  %p1364_p5 = pnand %p1363_p4, %p1357_p1 }
  0x2f   :  { %v148_v26 = vsub.f32 %v146_v17, %v147_v22  ;;  %v191_v27 = vand.u32 4294901760, %v190_v23  ;;  %1178 = vmatprep.subr.mxu0 %v1387_v0  ;;  %v198_v30 = vand.u32 4294901760, %v197_v24  ;;  %v205_v31 = vand.u32 4294901760, %v204_v28 }
  0x30   :  { %1168 = vmatpush3.msra.mxu1 %v184_v25  ;;  %v699_v45 = vsub.f32 %v1507_v35, %v698_v41  ;;  %v719_v48 = vand.u32 4294901760, %v1526_v44  ;;  %v706_v50 = vsub.f32 %v1519_v42, %v705_v46  ;;  %v713_v51 = vsub.f32 %v1523_v43, %v712_v47 }
  0x31   :  { %v149_v29 = vand.u32 4294901760, %v148_v26  ;;  %1169 = vmatprep.subr.mxu1 %v1387_v0 }
  0x32   :  { %1170 = vmatpush3.msra.mxu1 %v191_v27  ;;  %v700_v49 = vand.u32 4294901760, %v699_v45  ;;  %v720_v52 = vsub.f32 %v1526_v44, %v719_v48  ;;  %v707_v53 = vand.u32 4294901760, %v706_v50  ;;  %v714_v54 = vand.u32 4294901760, %v713_v51 }
  0x33   :  { %1165 = vmatmul.mubr.f32.vlgmr.msra.gmra.mxu0 %v149_v29  ;;  %1171 = vmatprep.subr.mxu1 %v1387_v0  ;;  %v1095_v29 = vld [vmem:[%s1609_s4] ss:$0 sm:$0xff] }
  0x34   :  { %1179 = vmatpush3.msra.mxu0 %v181_v11  ;;  %1172 = vmatpush3.msra.mxu1 %v198_v30  ;;  %v721_v55 = vand.u32 4294901760, %v720_v52 }
  0x35   :  { %1180 = vmatprep.subr.mxu0 %v1387_v0  ;;  %1173 = vmatprep.subr.mxu1 %v1387_v0 }
  0x36   :  { %1181 = vmatpush3.msra.mxu0 %v188_v13  ;;  %1174 = vmatpush3.msra.mxu1 %v205_v31 }
  0x37   :  { %1182 = vmatprep.subr.mxu0 %v1387_v0  ;;  %1176 = vmatmul.mubr.f32.vlgmr.msra.gmra.mxu1 %v1448_v12 }
  0x38   :  { %1183 = vmatpush3.msra.mxu0 %v195_v14  ;;  %1189 = vmatprep.subr.mxu1 %v1387_v0 }
  0x39   :  { %1184 = vmatprep.subr.mxu0 %v1387_v0  ;;  %1186 = vmatprep.mubr.msk.f32.mxu0 %vm1388_vm1, %v1387_v0 }
  0x3a   :  { %1185 = vmatpush3.msra.mxu0 %v202_v15  ;;  %1190 = vmatpush3.msra.mxu1 %v1437_v4 }
  0x3b   :  { %1187 = vmatmul.mubr.f32.vlgmr.msra.gmra.mxu0 %v146_v17  ;;  %1191 = vmatprep.subr.mxu1 %v1387_v0 }
  0x3c   :  { %1200 = vmatprep.subr.mxu0 %v1387_v0  ;;  %1192 = vmatpush3.msra.mxu1 %v1439_v5 }
  0x3d   :  { %1201 = vmatpush3.msra.mxu0 %v182_v16  ;;  %1193 = vmatprep.subr.mxu1 %v1387_v0 }
  0x3e   :  { %1202 = vmatprep.subr.mxu0 %v1387_v0  ;;  %1194 = vmatpush3.msra.mxu1 %v1441_v6 }
  0x3f   :  { %1203 = vmatpush3.msra.mxu0 %v189_v18  ;;  %1195 = vmatprep.subr.mxu1 %v1387_v0 }
  0x40   :  { %1204 = vmatprep.subr.mxu0 %v1387_v0  ;;  %1196 = vmatpush3.msra.mxu1 %v1443_v9 }
  0x41   :  { %1197 = vmatprep.mubr.msk.f32.mxu1 %vm1388_vm1, %v1387_v0  ;;  %1205 = vmatpush3.msra.mxu0 %v196_v19 }
  0x42   :  { %1198 = vmatmul.mubr.f32.vlgmr.msra.gmra.mxu1 %v147_v22  ;;  %1206 = vmatprep.subr.mxu0 %v1387_v0 }
  0x43   :  { %1211 = vmatprep.subr.mxu1 %v1387_v0  ;;  %1207 = vmatpush3.msra.mxu0 %v203_v20 }
  0x44   :  { %1208 = vmatprep.mubr.msk.f32.mxu0 %vm1388_vm1, %v1387_v0  ;;  %1212 = vmatpush3.msra.mxu1 %v1437_v4 }
  0x45   :  { %1209 = vmatmul.mubr.f32.vlgmr.msra.gmra.mxu0 %v1448_v12  ;;  %1213 = vmatprep.subr.mxu1 %v1387_v0 }
  0x46   :  { %1219 = vmatprep.mubr.msk.f32.mxu1 %vm1388_vm1, %v1387_v0  ;;  %1214 = vmatpush3.msra.mxu1 %v1439_v5 }
  0x47   :  { %1222 = vmatprep.subr.mxu0 %v1387_v0  ;;  %1215 = vmatprep.subr.mxu1 %v1387_v0 }
  0x48   :  { %1230 = vmatprep.mubr.msk.f32.mxu0 %vm1388_vm1, %v1387_v0  ;;  %1216 = vmatpush3.msra.mxu1 %v1441_v6 }
  0x49   :  { %1217 = vmatprep.subr.mxu1 %v1387_v0  ;;  %1223 = vmatpush3.msra.mxu0 %v1504_v33 }
  0x4a   :  { %1218 = vmatpush3.msra.mxu1 %v1443_v9  ;;  %1224 = vmatprep.subr.mxu0 %v1387_v0 }
  0x4b   :  { %1220 = vmatmul.mubr.f32.vlgmr.msra.gmra.mxu1 %v1448_v12  ;;  %1233 = vmatprep.subr.mxu1 %v1387_v0  ;;  %v1094_v12 = vld [vmem:[%s1607_s2] ss:$0 sm:$0xff] }
  0x4c   :  { %1241 = vmatprep.mubr.msk.f32.mxu1 %vm1388_vm1, %v1387_v0  ;;  %1225 = vmatpush3.msra.mxu0 %v1509_v36 }
  0x4d   :  { %1226 = vmatprep.subr.mxu0 %v1387_v0  ;;  %1234 = vmatpush3.msra.mxu1 %v700_v49 }
  0x4e   :  { %1227 = vmatpush3.msra.mxu0 %v1512_v39  ;;  %1235 = vmatprep.subr.mxu1 %v1387_v0 }
  0x4f   :  { %1228 = vmatprep.subr.mxu0 %v1387_v0  ;;  %1236 = vmatpush3.msra.mxu1 %v707_v53 }
  0x50   :  { %1229 = vmatpush3.msra.mxu0 %v1514_v40  ;;  %1237 = vmatprep.subr.mxu1 %v1387_v0 }
  0x51   :  { %1244 = vmatprep.subr.mxu0 %v1387_v0  ;;  %1238 = vmatpush3.msra.mxu1 %v714_v54 }
  0x52   :  { %1239 = vmatprep.subr.mxu1 %v1387_v0 }
  0x53   :  { %1240 = vmatpush3.msra.mxu1 %v721_v55 }
  0x54   :  { %1255 = vmatprep.subr.mxu1 %v1387_v0 }
  0xf3   :  { %v151_v56 = vpop.f32.mrf.mxu0 }
  0xf5   :  { %v1166_v57 = vpop.f32.mrf.mxu0 }
  0xf7   :  { %v242_v58 = vpop.f32.mrf.mxu1 }
  0xf8   :  { %v243_v62 = vadd.f32 %v242_v58, %v151_v56 }
  0xf9   :  { %v1177_v59 = vpop.f32.mrf.mxu1 }
  0xfb   :  { %v322_v60 = vpop.f32.mrf.mxu0 }
  0xfc   :  { %v323_v2 = vadd.f32 %v322_v60, %v243_v62 }
  0xfd   :  { %v1188_v61 = vpop.f32.mrf.mxu0 }
 0x102   :  { %v399_v63 = vpop.f32.mrf.mxu1 }
 0x103   :  { %v400_v4 = vadd.f32 %v399_v63, %v323_v2 }
 0x104   :  { %v1199_v1 = vpop.f32.mrf.mxu1 }
 0x105   :  { %v482_v3 = vpop.f32.mrf.mxu0 }
 0x106   :  { %v483_v6 = vadd.f32 %v482_v3, %v400_v4 }
 0x107   :  { %v1210_v5 = vpop.f32.mrf.mxu0 }
 0x10b   :  { %v557_v8 = vpop.f32.mrf.mxu1 }
 0x10c   :  { %v558_v9 = vadd.f32 %v557_v8, %v483_v6 }
 0x10d   :  { %v1221_v10 = vpop.f32.mrf.mxu1 }
 0x10e   :  { %v561_v11 = vadd.f32 %v558_v9, %v67_v7 }
 0x110   :  { %562 = vst.msk [vmem:[#allocation2] sm:$0xff] %vm64_vm0, %v561_v11 }
 0x117   :  { %v566_v13 = vld [vmem:[#allocation2] sm:$0xff] }
 0x118   :  { %v574_v14 = vadd.f32 %v1094_v12, %v566_v13 }
 0x11a   :  { %vm575_vm2 = vcmp.gt.f32.partialorder %v574_v14, 0.0  ;;  %v576_v15 = vmul.f32 0.2, %v574_v14 }
 0x11c   :  { %v577_v16 = vsel %vm575_vm2, %v574_v14, %v576_v15 }
 0x11d   :  { %v590_v17 = vsel %vm64_vm0, %v577_v16, 0 }
 0x11e   :  { %v661_v18 = vand.u32 4294901760, %v590_v17 }
 0x120   :  { %v662_v19 = vsub.f32 %v590_v17, %v661_v18  ;;  %1242 = vmatmul.mubr.f32.vlgmr.msra.gmra.mxu1 %v661_v18 }
 0x121   :  { %1256 = vmatpush3.msra.mxu1 %v1504_v33  ;;  %1263 = vmatprep.mubr.msk.f32.mxu1 %vm1388_vm1, %v1387_v0 }
 0x122   :  { %1257 = vmatprep.subr.mxu1 %v1387_v0  ;;  %v663_v20 = vand.u32 4294901760, %v662_v19 }
 0x123   :  { %1258 = vmatpush3.msra.mxu1 %v1509_v36 }
 0x124   :  { %1259 = vmatprep.subr.mxu1 %v1387_v0  ;;  %v664_v21 = vsub.f32 %v662_v19, %v663_v20 }
 0x125   :  { %1260 = vmatpush3.msra.mxu1 %v1512_v39 }
 0x126   :  { %1261 = vmatprep.subr.mxu1 %v1387_v0  ;;  %v665_v22 = vand.u32 4294901760, %v664_v21 }
 0x127   :  { %1262 = vmatpush3.msra.mxu1 %v1514_v40 }
 0x128   :  { %1264 = vmatmul.mubr.f32.vlgmr.msra.gmra.mxu1 %v663_v20  ;;  %1277 = vmatprep.subr.mxu1 %v1387_v0 }
 0x129   :  { %1231 = vmatmul.mubr.f32.vlgmr.msra.gmra.mxu0 %v665_v22  ;;  %1278 = vmatpush3.msra.mxu1 %v1504_v33 }
 0x12a   :  { %1245 = vmatpush3.msra.mxu0 %v1507_v35  ;;  %1279 = vmatprep.subr.mxu1 %v1387_v0 }
 0x12b   :  { %1246 = vmatprep.subr.mxu0 %v1387_v0  ;;  %1280 = vmatpush3.msra.mxu1 %v1509_v36 }
 0x12c   :  { %1247 = vmatpush3.msra.mxu0 %v1519_v42  ;;  %1281 = vmatprep.subr.mxu1 %v1387_v0 }
 0x12d   :  { %1248 = vmatprep.subr.mxu0 %v1387_v0  ;;  %1282 = vmatpush3.msra.mxu1 %v1512_v39 }
 0x12e   :  { %1249 = vmatpush3.msra.mxu0 %v1523_v43  ;;  %1283 = vmatprep.subr.mxu1 %v1387_v0 }
 0x12f   :  { %1250 = vmatprep.subr.mxu0 %v1387_v0  ;;  %1252 = vmatprep.mubr.msk.f32.mxu0 %vm1388_vm1, %v1387_v0 }
 0x130   :  { %1251 = vmatpush3.msra.mxu0 %v1526_v44  ;;  %1284 = vmatpush3.msra.mxu1 %v1514_v40 }
 0x131   :  { %1285 = vmatprep.mubr.msk.f32.mxu1 %vm1388_vm1, %v1387_v0  ;;  %1253 = vmatmul.mubr.f32.vlgmr.msra.gmra.mxu0 %v662_v19 }
 0x132   :  { %1266 = vmatprep.subr.mxu0 %v1387_v0  ;;  %1286 = vmatmul.mubr.f32.vlgmr.msra.gmra.mxu1 %v661_v18 }
 0x133   :  { %1267 = vmatpush3.msra.mxu0 %v698_v41  ;;  %1274 = vmatprep.mubr.msk.f32.mxu0 %vm1388_vm1, %v1387_v0 }
 0x134   :  { %1268 = vmatprep.subr.mxu0 %v1387_v0 }
 0x135   :  { %1269 = vmatpush3.msra.mxu0 %v705_v46 }
 0x136   :  { %1270 = vmatprep.subr.mxu0 %v1387_v0 }
 0x137   :  { %1271 = vmatpush3.msra.mxu0 %v712_v47 }
 0x138   :  { %1272 = vmatprep.subr.mxu0 %v1387_v0 }
 0x139   :  { %1273 = vmatpush3.msra.mxu0 %v719_v48 }
 0x13a   :  { %1275 = vmatmul.mubr.f32.vlgmr.msra.gmra.mxu0 %v661_v18 }
 0x1e0   :  { %v758_v23 = vpop.f32.mrf.mxu1 }
 0x1e2   :  { %v1243_v24 = vpop.f32.mrf.mxu1 }
 0x1e8   :  { %v915_v25 = vpop.f32.mrf.mxu1 }
 0x1e9   :  { %v667_v26 = vpop.f32.mrf.mxu0 }
 0x1ea   :  { %v1265_v27 = vpop.f32.mrf.mxu1  ;;  %v668_v30 = vadd.f32 %v1095_v29, %v667_v26 }
 0x1eb   :  { %v1232_v28 = vpop.f32.mrf.mxu0 }
 0x1ec   :  { %v759_v33 = vadd.f32 %v758_v23, %v668_v30 }
 0x1f1   :  { %v838_v31 = vpop.f32.mrf.mxu0 }
 0x1f2   :  { %v1073_v32 = vpop.f32.mrf.mxu1  ;;  %v839_v35 = vadd.f32 %v838_v31, %v759_v33 }
 0x1f3   :  { %v1254_v34 = vpop.f32.mrf.mxu0 }
 0x1f4   :  { %v1287_v0 = vpop.f32.mrf.mxu1  ;;  %v916_v36 = vadd.f32 %v915_v25, %v839_v35 }
 0x1fa   :  { %v998_v37 = vpop.f32.mrf.mxu0 }
 0x1fb   :  { %v999_v38 = vadd.f32 %v998_v37, %v916_v36 }
 0x1fc   :  { %v1276_v39 = vpop.f32.mrf.mxu0 }
 0x1fd   :  { %v1074_v40 = vadd.f32 %v1073_v32, %v999_v38 }
 0x1ff   :  { %1077 = vst [vmem:[#allocation9] sm:$0xff] %v1074_v40 }
 0x200   :  { %1367 = shalt.err (!%p1364_p5)
}
 0x201   :  { %1087 = dma.vmem_to_hbm [thread:$0]  %s1085_s11, 128, %s1610_s5, [#allocation5]  }
 0x202   :  { %1380 = dma.done.wait [#allocation5], 128  }
 0x203   :  { %1381 = vsyncadd [#allocation5], 4294967168 }
 0x204   :  { %1091 = vsyncpa [#allocation4], 1 }
 0x205   :  { %1092 = vsyncpa [#allocation7], 1 }
 0x206   :  { %1093 = vsyncpa [#allocation5], 1 }

</bundles_post_ra>
